<compile_context>
chip_gen: v7x
topology: tpu7x:2x2x1
jax: 0.10.0
libtpu: 0.0.40
codegen_flags: <defaults>
</compile_context>

<pallas_src>
import functools

import jax
import jax.numpy as jnp
from jax.experimental import pallas as pl
from jax.experimental.pallas import tpu as pltpu


def _round_up(x, m):
    return (x + m - 1) // m * m


def _mlp_disc_kernel(x_ref, w1_ref, b1_ref, w2_ref, b2_ref, w3_ref, b3_ref,
                     out_ref):
    x = x_ref[...]
    # Layer 1: Linear (f32 MXU accumulation) + bias/ReLU on the f32 accumulator.
    h1 = jnp.dot(x, w1_ref[...], preferred_element_type=jnp.float32) + b1_ref[...]
    h1 = jnp.maximum(h1, 0.0).astype(w2_ref.dtype)
    # Layer 2: Linear + ReLU.
    h2 = jnp.dot(h1, w2_ref[...], preferred_element_type=jnp.float32) + b2_ref[...]
    h2 = jnp.maximum(h2, 0.0).astype(w3_ref.dtype)
    # Layer 3: Linear (Identity output activation) -> logits (lane-padded to 128).
    logits = jnp.dot(h2, w3_ref[...], preferred_element_type=jnp.float32) + b3_ref[...]
    out_ref[...] = logits.astype(out_ref.dtype)


@functools.partial(jax.jit, static_argnames=("tile_b", "compute_dtype"))
def mlp_discriminator_forward(state, params, *, tile_b=None,
                              compute_dtype=jnp.bfloat16):
    """state: (batch, obs_dim) f32 -> logits: (batch, skill_dim) f32."""
    (w1, b1), (w2, b2), (w3, b3) = params
    batch, obs_dim = state.shape
    h1_dim = w1.shape[1]
    h2_dim = w2.shape[1]
    skill_dim = w3.shape[1]

    # Auto-pick the batch tile: big MXU-shaped tiles for large batches, minimal
    # sublane-aligned padding for small batches.
    if tile_b is None:
        tile_b = 256 if batch >= 256 else _round_up(batch, 8)

    # --- Lane-dense output: pad skill_dim up to a multiple of 128 columns. ---
    out_pad = _round_up(skill_dim, 128)
    if out_pad != skill_dim:
        w3 = jnp.pad(w3, ((0, 0), (0, out_pad - skill_dim)))
        b3 = jnp.pad(b3, ((0, 0), (0, out_pad - skill_dim)))

    # --- MXU-shaped batch tiles: pad batch to a whole number of tile_b tiles. ---
    num_tiles = pl.cdiv(batch, tile_b)
    batch_pad = num_tiles * tile_b

    # bf16 (or requested dtype) dot inputs; biases stay f32 for the f32 epilogue.
    x = state.astype(compute_dtype)
    if batch_pad != batch:
        x = jnp.pad(x, ((0, batch_pad - batch), (0, 0)))
    w1c = w1.astype(compute_dtype)
    w2c = w2.astype(compute_dtype)
    w3c = w3.astype(compute_dtype)
    b1f = b1.astype(jnp.float32)
    b2f = b2.astype(jnp.float32)
    b3f = b3.astype(jnp.float32)

    itemsize = jnp.dtype(compute_dtype).itemsize
    flops = 2 * batch_pad * (obs_dim * h1_dim + h1_dim * h2_dim + h2_dim * out_pad)
    bytes_accessed = (
        batch_pad * obs_dim * itemsize                      # state in
        + batch_pad * out_pad * 4                           # logits out (f32)
        + (obs_dim * h1_dim + h1_dim * h2_dim + h2_dim * out_pad) * itemsize
        + (h1_dim + h2_dim + out_pad) * 4)                  # biases (f32)

    resident = lambda i: (0, 0)  # weights/biases: same block every step -> stay in VMEM
    logits_padded = pl.pallas_call(
        _mlp_disc_kernel,
        out_shape=jax.ShapeDtypeStruct((batch_pad, out_pad), jnp.float32),
        grid=(num_tiles,),
        in_specs=[
            pl.BlockSpec((tile_b, obs_dim), lambda i: (i, 0)),   # state tile
            pl.BlockSpec((obs_dim, h1_dim), resident),           # w1
            pl.BlockSpec((1, h1_dim), resident),                 # b1
            pl.BlockSpec((h1_dim, h2_dim), resident),            # w2
            pl.BlockSpec((1, h2_dim), resident),                 # b2
            pl.BlockSpec((h2_dim, out_pad), resident),           # w3 (lane-padded)
            pl.BlockSpec((1, out_pad), resident),                # b3 (lane-padded)
        ],
        out_specs=pl.BlockSpec((tile_b, out_pad), lambda i: (i, 0)),
        compiler_params=pltpu.CompilerParams(
            dimension_semantics=("parallel",)),
        cost_estimate=pl.CostEstimate(
            flops=flops, transcendentals=0, bytes_accessed=bytes_accessed),
    )(x, w1c, b1f, w2c, b2f, w3c, b3f)

    # Strip batch padding and the padded logit columns (must be removed before
    # any downstream softmax / cross-entropy).
    return logits_padded[:batch, :skill_dim]


def init_params(key, obs_dim, skill_dim, hidden_sizes=(256, 256)):
    """Deterministic init matching nn.Linear default U(-1/sqrt(fan_in), +)."""
    sizes = [obs_dim] + list(hidden_sizes) + [skill_dim]
    params = []
    for j in range(len(sizes) - 1):
        fan_in, fan_out = sizes[j], sizes[j + 1]
        key, kw, kb = jax.random.split(key, 3)
        bound = 1.0 / (fan_in ** 0.5)
        w = jax.random.uniform(kw, (fan_in, fan_out), jnp.float32, -bound, bound)
        b = jax.random.uniform(kb, (1, fan_out), jnp.float32, -bound, bound)
        params.append((w, b))
    return params


def _reference_forward(state, params, compute_dtype=jnp.float32):
    """Pure-JAX reference mirroring the kernel's casting scheme."""
    (w1, b1), (w2, b2), (w3, b3) = params
    x = state.astype(compute_dtype)
    h = jnp.dot(x, w1.astype(compute_dtype),
                preferred_element_type=jnp.float32) + b1
    h = jnp.maximum(h, 0.0).astype(compute_dtype)
    h = jnp.dot(h, w2.astype(compute_dtype),
                preferred_element_type=jnp.float32) + b2
    h = jnp.maximum(h, 0.0).astype(compute_dtype)
    return jnp.dot(h, w3.astype(compute_dtype),
                   preferred_element_type=jnp.float32) + b3


if __name__ == "__main__":
    # Small shapes consistent with the module: state (batch, obs_dim),
    # hidden_sizes default (256, 256), skill_dim logits out.
    batch, obs_dim, skill_dim = 8, 16, 8
    hidden_sizes = (256, 256)  # module default

    key = jax.random.PRNGKey(0)
    key, k_state = jax.random.split(key)
    state = jax.random.normal(k_state, (batch, obs_dim), dtype=jnp.float32)
    params = init_params(key, obs_dim, skill_dim, hidden_sizes)

    # f32 path: exact match to the PyTorch-equivalent f32 forward.
    logits_f32 = mlp_discriminator_forward(state, params,
                                           compute_dtype=jnp.float32)
    logits_f32 = jax.block_until_ready(logits_f32)
    ref_f32 = _reference_forward(state, params, jnp.float32)
    assert logits_f32.shape == (batch, skill_dim)
    assert jnp.allclose(logits_f32, ref_f32, atol=1e-4, rtol=1e-4)

    # bf16 path (fast path on v6e/v7x): compared against a bf16-cast reference.
    logits_bf16 = mlp_discriminator_forward(state, params,
                                            compute_dtype=jnp.bfloat16)
    logits_bf16 = jax.block_until_ready(logits_bf16)
    ref_bf16 = _reference_forward(state, params, jnp.bfloat16)
    assert logits_bf16.shape == (batch, skill_dim)
    assert jnp.allclose(logits_bf16, ref_bf16, atol=1e-2, rtol=1e-2)

    print("KERNEL_OK")
</pallas_src>

<mosaic_0001>
module attributes {stable_mosaic.version = 11 : i64} {
  func.func @_mlp_disc_kernel(%arg0: i32, %arg1: memref<8x16xf32, #tpu.memory_space<vmem>>, %arg2: memref<16x256xf32, #tpu.memory_space<vmem>>, %arg3: memref<1x256xf32, #tpu.memory_space<vmem>>, %arg4: memref<256x256xf32, #tpu.memory_space<vmem>>, %arg5: memref<1x256xf32, #tpu.memory_space<vmem>>, %arg6: memref<256x128xf32, #tpu.memory_space<vmem>>, %arg7: memref<1x128xf32, #tpu.memory_space<vmem>>, %arg8: memref<8x128xf32, #tpu.memory_space<vmem>>) attributes {dimension_semantics = [#tpu.dimension_semantics<parallel>], iteration_bounds = array<i64: 1>, scalar_prefetch = 0 : i64, scratch_operands = 0 : i64, tpu.core_type = #tpu.core_type<tc>, window_params = [{transform_indices = @transform_0, window_bounds = array<i64: 8, 16>}, {pipeline_mode = #tpu.pipeline_mode<synchronous>, transform_indices = @transform_1, window_bounds = array<i64: 16, 256>}, {pipeline_mode = #tpu.pipeline_mode<synchronous>, transform_indices = @transform_2, window_bounds = array<i64: 1, 256>}, {pipeline_mode = #tpu.pipeline_mode<synchronous>, transform_indices = @transform_3, window_bounds = array<i64: 256, 256>}, {pipeline_mode = #tpu.pipeline_mode<synchronous>, transform_indices = @transform_4, window_bounds = array<i64: 1, 256>}, {pipeline_mode = #tpu.pipeline_mode<synchronous>, transform_indices = @transform_5, window_bounds = array<i64: 256, 128>}, {pipeline_mode = #tpu.pipeline_mode<synchronous>, transform_indices = @transform_6, window_bounds = array<i64: 1, 128>}, {transform_indices = @transform_7, window_bounds = array<i64: 8, 128>}]} {
    %c0 = arith.constant 0 : index
    %c0_0 = arith.constant 0 : index
    %0 = vector.load %arg1[%c0, %c0_0] : memref<8x16xf32, #tpu.memory_space<vmem>>, vector<8x16xf32>
    %c0_1 = arith.constant 0 : index
    %c0_2 = arith.constant 0 : index
    %1 = vector.load %arg2[%c0_1, %c0_2] : memref<16x256xf32, #tpu.memory_space<vmem>>, vector<16x256xf32>
    %cst = arith.constant dense<0.000000e+00> : vector<8x256xf32>
    %2 = tpu.matmul %0, %1, %cst {dimension_numbers = #tpu.dot_dimension_numbers<[1], [0], [0], [1], [0, 0, 1, 1], [], []>} : vector<8x16xf32>, vector<16x256xf32>, vector<8x256xf32> -> vector<8x256xf32>
    %c0_3 = arith.constant 0 : index
    %c0_4 = arith.constant 0 : index
    %3 = vector.load %arg3[%c0_3, %c0_4] : memref<1x256xf32, #tpu.memory_space<vmem>>, vector<1x256xf32>
    %4 = vector.broadcast %3 : vector<1x256xf32> to vector<8x256xf32>
    %5 = arith.addf %2, %4 : vector<8x256xf32>
    %cst_5 = arith.constant 0.000000e+00 : f32
    %6 = vector.broadcast %cst_5 : f32 to vector<8x256xf32>
    %7 = arith.maximumf %5, %6 : vector<8x256xf32>
    %c0_6 = arith.constant 0 : index
    %c0_7 = arith.constant 0 : index
    %8 = vector.load %arg4[%c0_6, %c0_7] : memref<256x256xf32, #tpu.memory_space<vmem>>, vector<256x256xf32>
    %cst_8 = arith.constant dense<0.000000e+00> : vector<8x256xf32>
    %9 = tpu.matmul %7, %8, %cst_8 {dimension_numbers = #tpu.dot_dimension_numbers<[1], [0], [0], [1], [0, 0, 1, 1], [], []>} : vector<8x256xf32>, vector<256x256xf32>, vector<8x256xf32> -> vector<8x256xf32>
    %c0_9 = arith.constant 0 : index
    %c0_10 = arith.constant 0 : index
    %10 = vector.load %arg5[%c0_9, %c0_10] : memref<1x256xf32, #tpu.memory_space<vmem>>, vector<1x256xf32>
    %11 = vector.broadcast %10 : vector<1x256xf32> to vector<8x256xf32>
    %12 = arith.addf %9, %11 : vector<8x256xf32>
    %cst_11 = arith.constant 0.000000e+00 : f32
    %13 = vector.broadcast %cst_11 : f32 to vector<8x256xf32>
    %14 = arith.maximumf %12, %13 : vector<8x256xf32>
    %c0_12 = arith.constant 0 : index
    %c0_13 = arith.constant 0 : index
    %15 = vector.load %arg6[%c0_12, %c0_13] : memref<256x128xf32, #tpu.memory_space<vmem>>, vector<256x128xf32>
    %cst_14 = arith.constant dense<0.000000e+00> : vector<8x128xf32>
    %16 = tpu.matmul %14, %15, %cst_14 {dimension_numbers = #tpu.dot_dimension_numbers<[1], [0], [0], [1], [0, 0, 1, 1], [], []>} : vector<8x256xf32>, vector<256x128xf32>, vector<8x128xf32> -> vector<8x128xf32>
    %c0_15 = arith.constant 0 : index
    %c0_16 = arith.constant 0 : index
    %17 = vector.load %arg7[%c0_15, %c0_16] : memref<1x128xf32, #tpu.memory_space<vmem>>, vector<1x128xf32>
    %18 = vector.broadcast %17 : vector<1x128xf32> to vector<8x128xf32>
    %19 = arith.addf %16, %18 : vector<8x128xf32>
    %c0_17 = arith.constant 0 : index
    %c0_18 = arith.constant 0 : index
    %20 = vector.load %arg8[%c0_17, %c0_18] : memref<8x128xf32, #tpu.memory_space<vmem>>, vector<8x128xf32>
    tpu.vector_store %arg8[%c0_17, %c0_18], %19 {strides = array<i32>} : memref<8x128xf32, #tpu.memory_space<vmem>>, vector<8x128xf32>,
    return
  }
  func.func @transform_0(%arg0: i32) -> (i32, i32) {
    %c0_i32 = arith.constant 0 : i32
    %c0_i32_0 = arith.constant 0 : i32
    return %arg0, %c0_i32 : i32, i32
  }
  func.func @transform_1(%arg0: i32) -> (i32, i32) {
    %c0_i32 = arith.constant 0 : i32
    %c0_i32_0 = arith.constant 0 : i32
    %c0_i32_1 = arith.constant 0 : i32
    return %c0_i32, %c0_i32_0 : i32, i32
  }
  func.func @transform_2(%arg0: i32) -> (i32, i32) {
    %c0_i32 = arith.constant 0 : i32
    %c0_i32_0 = arith.constant 0 : i32
    %c0_i32_1 = arith.constant 0 : i32
    return %c0_i32, %c0_i32_0 : i32, i32
  }
  func.func @transform_3(%arg0: i32) -> (i32, i32) {
    %c0_i32 = arith.constant 0 : i32
    %c0_i32_0 = arith.constant 0 : i32
    %c0_i32_1 = arith.constant 0 : i32
    return %c0_i32, %c0_i32_0 : i32, i32
  }
  func.func @transform_4(%arg0: i32) -> (i32, i32) {
    %c0_i32 = arith.constant 0 : i32
    %c0_i32_0 = arith.constant 0 : i32
    %c0_i32_1 = arith.constant 0 : i32
    return %c0_i32, %c0_i32_0 : i32, i32
  }
  func.func @transform_5(%arg0: i32) -> (i32, i32) {
    %c0_i32 = arith.constant 0 : i32
    %c0_i32_0 = arith.constant 0 : i32
    %c0_i32_1 = arith.constant 0 : i32
    return %c0_i32, %c0_i32_0 : i32, i32
  }
  func.func @transform_6(%arg0: i32) -> (i32, i32) {
    %c0_i32 = arith.constant 0 : i32
    %c0_i32_0 = arith.constant 0 : i32
    %c0_i32_1 = arith.constant 0 : i32
    return %c0_i32, %c0_i32_0 : i32, i32
  }
  func.func @transform_7(%arg0: i32) -> (i32, i32) {
    %c0_i32 = arith.constant 0 : i32
    %c0_i32_0 = arith.constant 0 : i32
    return %arg0, %c0_i32 : i32, i32
  }
}

</mosaic_0001>

<bundles_post_ra>
// kernel: mlp_discriminator_forward.1
= control target key start
LH: loop header
LB: loop body
LE: loop exit
PB: predicated region body
PF: predicated region fallthrough
CT: control target
= control target key end

     0   :  { %v557_v5 = vmov 0.0   ;;  %vm44_vm0 = vcmask 130048   ;;  %s923_s0 = inlined_call_operand.vmem [shape: f32[8,16], index: 0, kind: input, shape index: {}]   ;;  %s924_s1 = inlined_call_operand.vmem [shape: f32[16,256], index: 1, kind: input, shape index: {}]   ;;  %s925_s2 = inlined_call_operand.vmem [shape: f32[1,256], index: 2, kind: input, shape index: {}]   ;;  %s926_s3 = inlined_call_operand.vmem [shape: f32[256,256], index: 3, kind: input, shape index: {}]   ;;  %s927_s4 = inlined_call_operand.vmem [shape: f32[1,256], index: 4, kind: input, shape index: {}]   ;;  %s928_s5 = inlined_call_operand.vmem [shape: f32[256,128], index: 5, kind: input, shape index: {}]   ;;  %s929_s6 = inlined_call_operand.vmem [shape: f32[1,128], index: 6, kind: input, shape index: {}]   ;;  %s930_s7 = inlined_call_operand.hbm [shape: f32[8,128], index: 7, kind: output, shape index: {}]  }
   0x1   :  { %v29_v0 = vld [vmem:[%s924_s1 + $0x8] sm:$0xff]  ;;  %v31_v1 = vld [vmem:[%s924_s1 + $0x18] sm:$0xff]  ;;  %v28_v2 = vld [vmem:[%s924_s1] sm:$0xff]  ;;  %112 = vmatprep.mubr.f32.mxu0 %v557_v5 }
   0x2   :  { %v431_v3 = vpack.c.bf16 %v31_v1, %v29_v0  ;;  %v30_v4 = vld [vmem:[%s924_s1 + $0x10] sm:$0xff]  ;;  %v122_v6 = vld [vmem:[%s926_s3 + $0x8] sm:$0xff]  ;;  %v27_v8 = vld [vmem:[%s923_s0] sm:$0xff] }
   0x3   :  { %v433_v7 = vpack.c.bf16 %v30_v4, %v28_v2  ;;  %v124_v9 = vld [vmem:[%s926_s3 + $0x18] sm:$0xff]  ;;  %v121_v10 = vld [vmem:[%s926_s3] sm:$0xff]  ;;  %v123_v11 = vld [vmem:[%s926_s3 + $0x10] sm:$0xff] }
   0x4   :  { %432 = vmatprep.subr.bf16.mxu0 %v431_v3  ;;  %v435_v12 = vpack.c.bf16 %v124_v9, %v122_v6  ;;  %v437_v13 = vpack.c.bf16 %v123_v11, %v121_v10  ;;  %v126_v14 = vld [vmem:[%s926_s3 + $0x28] sm:$0xff]  ;;  %v128_v15 = vld [vmem:[%s926_s3 + $0x38] sm:$0xff]  ;;  %v125_v16 = vld [vmem:[%s926_s3 + $0x20] sm:$0xff] }
   0x5   :  { %434 = vmatpush1.bf16.msra.mxu0 %v433_v7  ;;  %v439_v17 = vpack.c.bf16 %v128_v15, %v126_v14  ;;  %v127_v18 = vld [vmem:[%s926_s3 + $0x30] sm:$0xff]  ;;  %v130_v19 = vld [vmem:[%s926_s3 + $0x48] sm:$0xff]  ;;  %v132_v20 = vld [vmem:[%s926_s3 + $0x58] sm:$0xff] }
   0x6   :  { %436 = vmatprep.subr.bf16.mxu1 %v435_v12  ;;  %v441_v21 = vpack.c.bf16 %v127_v18, %v125_v16  ;;  %v443_v22 = vpack.c.bf16 %v132_v20, %v130_v19  ;;  %v129_v23 = vld [vmem:[%s926_s3 + $0x40] sm:$0xff]  ;;  %v131_v24 = vld [vmem:[%s926_s3 + $0x50] sm:$0xff]  ;;  %v134_v25 = vld [vmem:[%s926_s3 + $0x68] sm:$0xff] }
   0x7   :  { %438 = vmatpush1.bf16.msra.mxu1 %v437_v13  ;;  %v136_v26 = vld [vmem:[%s926_s3 + $0x78] sm:$0xff]  ;;  %v445_v27 = vpack.c.bf16 %v131_v24, %v129_v23  ;;  %v133_v29 = vld [vmem:[%s926_s3 + $0x60] sm:$0xff]  ;;  %v135_v30 = vld [vmem:[%s926_s3 + $0x70] sm:$0xff] }
   0x8   :  { %394 = vmatmul.mubr.msk.f32.vlgmr.msra.gmra.mrb[0].mxu0 %vm44_vm0, %v27_v8  ;;  %440 = vmatprep.subr.bf16.mxu1 %v439_v17  ;;  %v447_v28 = vpack.c.bf16 %v136_v26, %v134_v25  ;;  %v138_v31 = vld [vmem:[%s926_s3 + $0x88] sm:$0xff]  ;;  %v140_v32 = vld [vmem:[%s926_s3 + $0x98] sm:$0xff]  ;;  %v449_v33 = vpack.c.bf16 %v135_v30, %v133_v29  ;;  %v137_v35 = vld [vmem:[%s926_s3 + $0x80] sm:$0xff] }
   0x9   :  { %v451_v34 = vpack.c.bf16 %v140_v32, %v138_v31  ;;  %v139_v36 = vld [vmem:[%s926_s3 + $0x90] sm:$0xff]  ;;  %v142_v37 = vld [vmem:[%s926_s3 + $0xa8] sm:$0xff]  ;;  %v144_v38 = vld [vmem:[%s926_s3 + $0xb8] sm:$0xff] }
   0xa   :  { %v453_v39 = vpack.c.bf16 %v139_v36, %v137_v35  ;;  %v455_v40 = vpack.c.bf16 %v144_v38, %v142_v37  ;;  %v141_v41 = vld [vmem:[%s926_s3 + $0xa0] sm:$0xff]  ;;  %v143_v42 = vld [vmem:[%s926_s3 + $0xb0] sm:$0xff]  ;;  %v146_v43 = vld [vmem:[%s926_s3 + $0xc8] sm:$0xff] }
   0xb   :  { %442 = vmatpush1.bf16.msra.mxu1 %v441_v21  ;;  %v148_v44 = vld [vmem:[%s926_s3 + $0xd8] sm:$0xff] }
   0xc   :  { %444 = vmatprep.subr.bf16.mxu1 %v443_v22 }
   0xf   :  { %446 = vmatpush1.bf16.msra.mxu1 %v445_v27 }
  0x10   :  { %448 = vmatprep.subr.bf16.mxu1 %v447_v28 }
  0x13   :  { %450 = vmatpush1.bf16.msra.mxu1 %v449_v33 }
  0x14   :  { %452 = vmatprep.subr.bf16.mxu1 %v451_v34 }
  0x15   :  { %12 = vsyncpa [#allocation3], 0  ;;  %v457_v45 = vpack.c.bf16 %v143_v42, %v141_v41  ;;  %v459_v46 = vpack.c.bf16 %v148_v44, %v146_v43  ;;  %v145_v47 = vld [vmem:[%s926_s3 + $0xc0] sm:$0xff]  ;;  %v147_v48 = vld [vmem:[%s926_s3 + $0xd0] sm:$0xff]  ;;  %s558_s27 = smov [#allocation2]  }
  0x16   :  { %v150_v49 = vld [vmem:[%s926_s3 + $0xe8] sm:$0xff]  ;;  %v152_v50 = vld [vmem:[%s926_s3 + $0xf8] sm:$0xff]  ;;  %v461_v51 = vpack.c.bf16 %v147_v48, %v145_v47  ;;  %v149_v53 = vld [vmem:[%s926_s3 + $0xe0] sm:$0xff]  ;;  %s386_s28 = sshll.u32 %s558_s27, 4  ;;  %s387_s28 = int_to_ptr.vmem [resolvable:$true] %s386_s28 }
  0x17   :  { %454 = vmatpush1.bf16.msra.mxu1 %v453_v39  ;;  %v463_v52 = vpack.c.bf16 %v152_v50, %v150_v49  ;;  %v151_v54 = vld [vmem:[%s926_s3 + $0xf0] sm:$0xff]  ;;  %v154_v55 = vld [vmem:[%s926_s3 + $0x108] sm:$0xff]  ;;  %v156_v56 = vld [vmem:[%s926_s3 + $0x118] sm:$0xff]  ;;  %p538_p1 = scmp.lt.s32.totalorder %s387_s28, %s387_s28 }
  0x18   :  { %456 = vmatprep.subr.bf16.mxu1 %v455_v40  ;;  %v465_v57 = vpack.c.bf16 %v151_v54, %v149_v53  ;;  %v467_v58 = vpack.c.bf16 %v156_v56, %v154_v55  ;;  %v153_v59 = vld [vmem:[%s926_s3 + $0x100] sm:$0xff]  ;;  %v155_v60 = vld [vmem:[%s926_s3 + $0x110] sm:$0xff]  ;;  %v158_v61 = vld [vmem:[%s926_s3 + $0x128] sm:$0xff] }
  0x19   :  { %v160_v62 = vld [vmem:[%s926_s3 + $0x138] sm:$0xff]  ;;  %v469_v63 = vpack.c.bf16 %v155_v60, %v153_v59  ;;  %v157_v1 = vld [vmem:[%s926_s3 + $0x120] sm:$0xff]  ;;  %v159_v2 = vld [vmem:[%s926_s3 + $0x130] sm:$0xff] }
  0x1a   :  { %v471_v0 = vpack.c.bf16 %v160_v62, %v158_v61  ;;  %v162_v3 = vld [vmem:[%s926_s3 + $0x148] sm:$0xff]  ;;  %v164_v4 = vld [vmem:[%s926_s3 + $0x158] sm:$0xff]  ;;  %v473_v5 = vpack.c.bf16 %v159_v2, %v157_v1  ;;  %v161_v7 = vld [vmem:[%s926_s3 + $0x140] sm:$0xff] }
  0x1b   :  { %458 = vmatpush1.bf16.msra.mxu1 %v457_v45  ;;  %v475_v6 = vpack.c.bf16 %v164_v4, %v162_v3  ;;  %v163_v8 = vld [vmem:[%s926_s3 + $0x150] sm:$0xff]  ;;  %v166_v9 = vld [vmem:[%s926_s3 + $0x168] sm:$0xff]  ;;  %v168_v10 = vld [vmem:[%s926_s3 + $0x178] sm:$0xff] }
  0x1c   :  { %460 = vmatprep.subr.bf16.mxu1 %v459_v46  ;;  %v477_v11 = vpack.c.bf16 %v163_v8, %v161_v7  ;;  %v479_v12 = vpack.c.bf16 %v168_v10, %v166_v9  ;;  %v165_v13 = vld [vmem:[%s926_s3 + $0x160] sm:$0xff]  ;;  %v167_v14 = vld [vmem:[%s926_s3 + $0x170] sm:$0xff]  ;;  %v170_v15 = vld [vmem:[%s926_s3 + $0x188] sm:$0xff] }
  0x1d   :  { %v172_v16 = vld [vmem:[%s926_s3 + $0x198] sm:$0xff]  ;;  %v481_v17 = vpack.c.bf16 %v167_v14, %v165_v13  ;;  %v169_v19 = vld [vmem:[%s926_s3 + $0x180] sm:$0xff]  ;;  %v171_v20 = vld [vmem:[%s926_s3 + $0x190] sm:$0xff] }
  0x1e   :  { %v483_v18 = vpack.c.bf16 %v172_v16, %v170_v15  ;;  %v174_v21 = vld [vmem:[%s926_s3 + $0x1a8] sm:$0xff]  ;;  %v176_v22 = vld [vmem:[%s926_s3 + $0x1b8] sm:$0xff]  ;;  %v485_v23 = vpack.c.bf16 %v171_v20, %v169_v19  ;;  %v173_v25 = vld [vmem:[%s926_s3 + $0x1a0] sm:$0xff]  ;;  %v34_v15 = vlaneseq }
  0x1f   :  { %462 = vmatpush1.bf16.msra.mxu1 %v461_v51  ;;  %v487_v24 = vpack.c.bf16 %v176_v22, %v174_v21  ;;  %v175_v26 = vld [vmem:[%s926_s3 + $0x1b0] sm:$0xff]  ;;  %v178_v27 = vld [vmem:[%s926_s3 + $0x1c8] sm:$0xff]  ;;  %v180_v28 = vld [vmem:[%s926_s3 + $0x1d8] sm:$0xff] }
  0x20   :  { %464 = vmatprep.subr.bf16.mxu1 %v463_v52  ;;  %v489_v29 = vpack.c.bf16 %v175_v26, %v173_v25  ;;  %v491_v30 = vpack.c.bf16 %v180_v28, %v178_v27  ;;  %v177_v31 = vld [vmem:[%s926_s3 + $0x1c0] sm:$0xff]  ;;  %v179_v32 = vld [vmem:[%s926_s3 + $0x1d0] sm:$0xff]  ;;  %v182_v34 = vld [vmem:[%s926_s3 + $0x1e8] sm:$0xff]  ;;  %v35_v16 = vshrl.u32 %v34_v15, 7 }
  0x21   :  { %v493_v33 = vpack.c.bf16 %v179_v32, %v177_v31  ;;  %v184_v35 = vld [vmem:[%s926_s3 + $0x1f8] sm:$0xff]  ;;  %v181_v37 = vld [vmem:[%s926_s3 + $0x1e0] sm:$0xff]  ;;  %v183_v38 = vld [vmem:[%s926_s3 + $0x1f0] sm:$0xff] }
  0x22   :  { %v495_v36 = vpack.c.bf16 %v184_v35, %v182_v34  ;;  %v497_v39 = vpack.c.bf16 %v183_v38, %v181_v37  ;;  %v286_v40 = vld [vmem:[%s928_s5 + $0x80] sm:$0xff]  ;;  %v287_v41 = vld [vmem:[%s928_s5 + $0x88] sm:$0xff]  ;;  %v288_v45 = vld [vmem:[%s928_s5 + $0x90] sm:$0xff]  ;;  %v40_v19 = vsub.s32 1, %v35_v16 }
  0x23   :  { %466 = vmatpush1.bf16.msra.mxu1 %v465_v57  ;;  %v270_v42 = vld [vmem:[%s928_s5] sm:$0xff]  ;;  %v499_v43 = vpack.c.bf16 %v287_v41, %v286_v40  ;;  %v271_v44 = vld [vmem:[%s928_s5 + $0x8] sm:$0xff]  ;;  %v289_v46 = vld [vmem:[%s928_s5 + $0x98] sm:$0xff] }
  0x24   :  { %468 = vmatprep.subr.bf16.mxu1 %v467_v58  ;;  %v501_v47 = vpack.c.bf16 %v271_v44, %v270_v42  ;;  %v503_v48 = vpack.c.bf16 %v289_v46, %v288_v45  ;;  %v272_v49 = vld [vmem:[%s928_s5 + $0x10] sm:$0xff]  ;;  %v273_v50 = vld [vmem:[%s928_s5 + $0x18] sm:$0xff]  ;;  %v290_v51 = vld [vmem:[%s928_s5 + $0xa0] sm:$0xff] }
  0x25   :  { %500 = vmatprep.subr.bf16.mxu0 %v499_v43  ;;  %v291_v52 = vld [vmem:[%s928_s5 + $0xa8] sm:$0xff]  ;;  %v505_v53 = vpack.c.bf16 %v273_v50, %v272_v49  ;;  %v274_v55 = vld [vmem:[%s928_s5 + $0x20] sm:$0xff]  ;;  %v292_v57 = vld [vmem:[%s928_s5 + $0xb0] sm:$0xff] }
  0x26   :  { %502 = vmatpush3.bf16.msra.mxu0 %v501_v47  ;;  %v507_v54 = vpack.c.bf16 %v291_v52, %v290_v51  ;;  %v275_v56 = vld [vmem:[%s928_s5 + $0x28] sm:$0xff]  ;;  %v293_v58 = vld [vmem:[%s928_s5 + $0xb8] sm:$0xff]  ;;  %v276_v61 = vld [vmem:[%s928_s5 + $0x30] sm:$0xff] }
  0x27   :  { %470 = vmatpush1.bf16.msra.mxu1 %v469_v63  ;;  %504 = vmatprep.subr.bf16.mxu0 %v503_v48  ;;  %v509_v59 = vpack.c.bf16 %v275_v56, %v274_v55  ;;  %v511_v60 = vpack.c.bf16 %v293_v58, %v292_v57  ;;  %v277_v62 = vld [vmem:[%s928_s5 + $0x38] sm:$0xff]  ;;  %v294_v63 = vld [vmem:[%s928_s5 + $0xc0] sm:$0xff]  ;;  %v279_v4 = vld [vmem:[%s928_s5 + $0x48] sm:$0xff] }
  0x28   :  { %472 = vmatprep.subr.bf16.mxu1 %v471_v0  ;;  %v295_v0 = vld [vmem:[%s928_s5 + $0xc8] sm:$0xff]  ;;  %v513_v1 = vpack.c.bf16 %v277_v62, %v276_v61  ;;  %v278_v3 = vld [vmem:[%s928_s5 + $0x40] sm:$0xff]  ;;  %v280_v9 = vld [vmem:[%s928_s5 + $0x50] sm:$0xff] }
  0x29   :  { %v515_v2 = vpack.c.bf16 %v295_v0, %v294_v63  ;;  %v517_v7 = vpack.c.bf16 %v279_v4, %v278_v3  ;;  %v281_v10 = vld [vmem:[%s928_s5 + $0x58] sm:$0xff]  ;;  %v282_v28 = vld [vmem:[%s928_s5 + $0x60] sm:$0xff]  ;;  %v300_v31 = vld [vmem:[%s928_s5 + $0xf0] sm:$0xff] }
  0x2a   :  { %506 = vmatpush3.bf16.msra.mxu0 %v505_v53  ;;  %v521_v13 = vpack.c.bf16 %v281_v10, %v280_v9  ;;  %v301_v32 = vld [vmem:[%s928_s5 + $0xf8] sm:$0xff]  ;;  %v284_v34 = vld [vmem:[%s928_s5 + $0x70] sm:$0xff]  ;;  %v185_v37 = vld [vmem:[%s927_s4] sm:$0x3]  ;;  %s533_s4 = scalar_lea.vmem %s387_s28, 128 }
  0x2b   :  { %474 = vmatpush1.bf16.msra.mxu1 %v473_v5  ;;  %508 = vmatprep.subr.bf16.mxu0 %v507_v54  ;;  %v296_v5 = vld [vmem:[%s928_s5 + $0xd0] sm:$0xff]  ;;  %v285_v35 = vld [vmem:[%s928_s5 + $0x78] sm:$0xff]  ;;  %v395_v48 = vld [vmem:[%s929_s6] ss:$0 sm:$0xff]  ;;  %p534_p0 = scmp.ne.s32.totalorder %s387_s28, %s533_s4  ;;  %p539_p2 = scmp.lt.s32.totalorder %s533_s4, %s533_s4 }
  0x2c   :  { %476 = vmatprep.subr.bf16.mxu1 %v475_v6  ;;  %v297_v6 = vld [vmem:[%s928_s5 + $0xd8] sm:$0xff] }
  0x2d   :  { %v519_v8 = vpack.c.bf16 %v297_v6, %v296_v5  ;;  %p540_p3 = por %p539_p2, %p538_p1 }
  0x2e   :  { %510 = vmatpush3.bf16.msra.mxu0 %v509_v59 }
  0x2f   :  { %478 = vmatpush1.bf16.msra.mxu1 %v477_v11  ;;  %512 = vmatprep.subr.bf16.mxu0 %v511_v60  ;;  %v298_v11 = vld [vmem:[%s928_s5 + $0xe0] sm:$0xff]  ;;  %p541_p4 = pnand %p540_p3, %p534_p0 }
  0x30   :  { %480 = vmatprep.subr.bf16.mxu1 %v479_v12  ;;  %v299_v12 = vld [vmem:[%s928_s5 + $0xe8] sm:$0xff] }
  0x31   :  { %v523_v14 = vpack.c.bf16 %v299_v12, %v298_v11 }
  0x32   :  { %514 = vmatpush3.bf16.msra.mxu0 %v513_v1 }
  0x33   :  { %482 = vmatpush1.bf16.msra.mxu1 %v481_v17  ;;  %516 = vmatprep.subr.bf16.mxu0 %v515_v2  ;;  %v36_v17 = vsub.s32 0, %v35_v16 }
  0x34   :  { %484 = vmatprep.subr.bf16.mxu1 %v483_v18  ;;  %v32_v18 = vld [vmem:[%s925_s2] sm:$0x3] }
  0x35   :  { %v37_v20 = vrot.slane %v32_v18, %v36_v17  ;;  %v41_v21 = vrot.slane %v32_v18, %v40_v19  ;;  %v190_v38 = vrot.slane %v185_v37, %v36_v17 }
  0x36   :  { %518 = vmatpush3.bf16.msra.mxu0 %v517_v7 }
  0x37   :  { %486 = vmatpush1.bf16.msra.mxu1 %v485_v23  ;;  %520 = vmatprep.subr.bf16.mxu0 %v519_v8 }
  0x38   :  { %488 = vmatprep.subr.bf16.mxu1 %v487_v24 }
  0x3a   :  { %522 = vmatpush3.bf16.msra.mxu0 %v521_v13 }
  0x3b   :  { %490 = vmatpush1.bf16.msra.mxu1 %v489_v29  ;;  %524 = vmatprep.subr.bf16.mxu0 %v523_v14  ;;  %v283_v29 = vld [vmem:[%s928_s5 + $0x68] sm:$0xff] }
  0x3c   :  { %492 = vmatprep.subr.bf16.mxu1 %v491_v30  ;;  %v525_v30 = vpack.c.bf16 %v283_v29, %v282_v28 }
  0x3e   :  { %526 = vmatpush3.bf16.msra.mxu0 %v525_v30 }
  0x3f   :  { %494 = vmatpush1.bf16.msra.mxu1 %v493_v33  ;;  %v527_v33 = vpack.c.bf16 %v301_v32, %v300_v31 }
  0x40   :  { %496 = vmatprep.subr.bf16.mxu1 %v495_v36  ;;  %v529_v36 = vpack.c.bf16 %v285_v35, %v284_v34 }
  0x41   :  { %528 = vmatprep.subr.bf16.mxu0 %v527_v33 }
  0x42   :  { %530 = vmatpush3.bf16.msra.mxu0 %v529_v36 }
  0x43   :  { %498 = vmatpush1.bf16.msra.mxu1 %v497_v39  ;;  %v194_v39 = vrot.slane %v185_v37, %v40_v19 }
  0xdb   :  { %v114_v22 = vpop.f32.mrb[0].mxu0 }
  0xdc   :  { %v115_v23 = vadd.f32 %v114_v22, %v37_v20  ;;  %v116_v24 = vpop.f32.mrb[1].mxu0 }
  0xdd   :  { %v117_v25 = vadd.f32 %v116_v24, %v41_v21 }
  0xde   :  { %v119_v27 = vmax.f32 %v115_v23, 0.0 }
  0xdf   :  { %v120_v26 = vmax.f32 %v117_v25, 0.0 }
  0xe1   :  { %261 = vmatprep.mubr.f32.mxu1 %v120_v26 }
  0xe2   :  { %262 = vmatmul.mubr.f32.vlgmr.msra.gmra.mrb[0].mxu1 %v119_v27 }
 0x1b5   :  { %v263_v40 = vpop.f32.mrb[0].mxu1 }
 0x1b6   :  { %v264_v41 = vadd.f32 %v263_v40, %v190_v38  ;;  %v265_v42 = vpop.f32.mrb[1].mxu1 }
 0x1b7   :  { %v266_v43 = vadd.f32 %v265_v42, %v194_v39 }
 0x1b8   :  { %v268_v45 = vmax.f32 %v264_v41, 0.0 }
 0x1b9   :  { %v269_v44 = vmax.f32 %v266_v43, 0.0 }
 0x1bb   :  { %373 = vmatprep.mubr.f32.mxu0 %v269_v44 }
 0x1bc   :  { %374 = vmatmul.mubr.f32.vlgmr.msra.gmra.mrb[2].mxu0 %v268_v45 }
 0x28f   :  { %v428_v46 = vpop.f32.mrb[2].mxu0 }
 0x290   :  { %v429_v47 = vpop.f32.mrb[3].mxu0 }
 0x291   :  { %v430_v49 = vadd.f32 %v429_v47, %v428_v46 }
 0x293   :  { %v376_v50 = vadd.f32 %v430_v49, %v395_v48 }
 0x295   :  { %379 = vst [vmem:[#allocation2] sm:$0xff] %v376_v50 }
 0x296   :  { %544 = shalt.err (!%p541_p4)
}
 0x297   :  { %s545_s8 = scalar_lea.hbm %s930_s7, 128 }
 0x298   :  { %p546_p5 = scmp.ne.s32.totalorder %s930_s7, %s545_s8  ;;  %p549_p6 = scmp.lt.u32.totalorder %s545_s8, %s930_s7 }
 0x29a   :  { %p551_p7 = pnand %p549_p6, %p546_p5 }
 0x29c   :  { %554 = shalt.err (!%p551_p7)
}
 0x29d   :  { %389 = dma.vmem_to_hbm [thread:$0]  %s387_s28, 128, %s930_s7, [#allocation3]  }
 0x29e   :  { %555 = dma.done.wait [#allocation3], 128  }
 0x29f   :  { %556 = vsyncadd [#allocation3], 4294967168 }
 0x2a0   :  { %393 = vsyncpa [#allocation3], 1 }

</bundles_post_ra>
